<compile_context>
chip_gen: v7x
topology: tpu7x:2x2x1
jax: 0.10.0
libtpu: 0.0.40
codegen_flags: <defaults>
</compile_context>

<pallas_src>
import functools

import jax
import jax.numpy as jnp
from jax.experimental import pallas as pl
from jax.experimental.pallas import tpu as pltpu


def _qua_loss_kernel(im1_ref, im2_ref, h1_ref, h2_ref, out_ref, acc_ref, *,
                     margin, inv_n, n_valid, need_mask):
    # ---- init the running sum on the first grid step -----------------------
    @pl.when(pl.program_id(0) == 0)
    def _():
        acc_ref[...] = jnp.zeros_like(acc_ref)

    def load_f32(ref):
        x = ref[...]
        if x.dtype != jnp.float32:          # static guard: no-op for f32 inputs
            x = x.astype(jnp.float32)
        return x

    im1 = load_f32(im1_ref)
    im2 = load_f32(im2_ref)
    h1 = load_f32(h1_ref)
    h2 = load_f32(h2_ref)

    tile_n, d = im1.shape
    ones_d = jnp.ones((d, 1), jnp.float32)  # reduction matrix for the MXU

    def row_dist(a, b):
        diff = a - b
        sq = diff * diff
        # (tile_n, d) @ (d, 1): per-row sum of squares on the MXU (XLU stays free)
        ssq = jnp.dot(sq, ones_d, preferred_element_type=jnp.float32)
        # NOTE: torch.sqrt has no eps, so neither does this (exact forward match);
        # add an eps inside the sqrt if this kernel is ever differentiated.
        return jnp.sqrt(ssq)                # (tile_n, 1)

    d0 = row_dist(im1, im2)                 # pairo
    d1 = row_dist(im1, h1)                  # pair1
    d2 = row_dist(im2, h2)                  # pair2

    # MarginRankingLoss(margin), y = +1, reduction='mean':
    #   mean(max(0, pairo - pairX + margin))
    l1 = jnp.maximum(d0 - d1 + margin, 0.0)
    l2 = jnp.maximum(d0 - d2 + margin, 0.0)
    contrib = l1 + l2                       # (tile_n, 1)

    if need_mask:  # only emitted when N was padded; zero out the padded rows
        rows = (pl.program_id(0) * tile_n
                + jax.lax.broadcasted_iota(jnp.int32, contrib.shape, 0))
        contrib = jnp.where(rows < n_valid, contrib, 0.0)

    acc_ref[...] += jnp.reshape(jnp.sum(contrib), (1, 1))

    # ---- finalize on the last grid step: mean == sum * (1/N) ----------------
    @pl.when(pl.program_id(0) == pl.num_programs(0) - 1)
    def _():
        out_ref[...] = acc_ref[...] * inv_n


def qua_loss(im1, im2, hard1, hard2, margin=0.3):
    assert im1.shape == im2.shape == hard1.shape == hard2.shape
    assert im1.ndim == 2
    n, d = im1.shape

    # ---- tile sizing: target ~2 MiB of (lane-padded) f32 per input tile -----
    d_lanes = pl.cdiv(d, 128) * 128          # VMEM pads the lane dim to 128
    bytes_per_row = d_lanes * 4
    tile_n = (2 * 1024 * 1024) // bytes_per_row
    tile_n = max(8, min(1024, (tile_n // 8) * 8))
    tile_n = min(tile_n, pl.cdiv(n, 8) * 8)  # never bigger than (padded) N
    num_tiles = pl.cdiv(n, tile_n)
    n_pad = num_tiles * tile_n
    need_mask = n_pad != n

    if need_mask:
        pad = ((0, n_pad - n), (0, 0))
        im1, im2, hard1, hard2 = (jnp.pad(x, pad)
                                  for x in (im1, im2, hard1, hard2))

    in_spec = pl.BlockSpec((tile_n, d), lambda i: (i, 0))

    out = pl.pallas_call(
        functools.partial(
            _qua_loss_kernel,
            margin=float(margin),
            inv_n=1.0 / n,                   # static scale, no runtime divide
            n_valid=n,
            need_mask=need_mask,
        ),
        out_shape=jax.ShapeDtypeStruct((1, 1), jnp.float32),
        grid_spec=pltpu.PrefetchScalarGridSpec(
            num_scalar_prefetch=0,
            grid=(num_tiles,),
            in_specs=[in_spec, in_spec, in_spec, in_spec],
            out_specs=pl.BlockSpec((1, 1), lambda i: (0, 0)),
            scratch_shapes=[pltpu.VMEM((1, 1), jnp.float32)],
        ),
        compiler_params=pltpu.CompilerParams(
            # the single grid axis carries the running sum -> reduction axis
            dimension_semantics=("arbitrary",),
            # 4 inputs x 2 buffers x <=2 MiB tiles fits comfortably on all gens
            vmem_limit_bytes=32 * 1024 * 1024,
        ),
    )(im1, im2, hard1, hard2)
    return out[0, 0]


def qua_loss_ref(im1, im2, hard1, hard2, margin=0.3):
    def dis(a, b):
        return jnp.sqrt(jnp.sum((a - b) ** 2, axis=1))

    d0, d1, d2 = dis(im1, im2), dis(im1, hard1), dis(im2, hard2)
    l1 = jnp.mean(jnp.maximum(d0 - d1 + margin, 0.0))
    l2 = jnp.mean(jnp.maximum(d0 - d2 + margin, 0.0))
    return l1 + l2


if __name__ == "__main__":
    # small shape implied by the module: (batch, feature) embeddings
    k1, k2, k3, k4 = jax.random.split(jax.random.PRNGKey(0), 4)
    N, D = 8, 32
    im1 = jax.random.normal(k1, (N, D), dtype=jnp.float32)
    im2 = jax.random.normal(k2, (N, D), dtype=jnp.float32)
    hard1 = jax.random.normal(k3, (N, D), dtype=jnp.float32)
    hard2 = jax.random.normal(k4, (N, D), dtype=jnp.float32)

    loss = jax.block_until_ready(qua_loss(im1, im2, hard1, hard2))
    ref = qua_loss_ref(im1, im2, hard1, hard2)
    assert jnp.allclose(loss, ref, rtol=1e-4, atol=1e-5), (loss, ref)

    # secondary check: multi-tile grid + ragged-N masking path
    k5, k6, k7, k8 = jax.random.split(jax.random.PRNGKey(1), 4)
    N2, D2 = 1037, 96
    a = jax.random.normal(k5, (N2, D2), dtype=jnp.float32)
    b = jax.random.normal(k6, (N2, D2), dtype=jnp.float32)
    c = jax.random.normal(k7, (N2, D2), dtype=jnp.float32)
    e = jax.random.normal(k8, (N2, D2), dtype=jnp.float32)
    loss2 = jax.block_until_ready(qua_loss(a, b, c, e))
    ref2 = qua_loss_ref(a, b, c, e)
    assert jnp.allclose(loss2, ref2, rtol=1e-4, atol=1e-5), (loss2, ref2)

    print("KERNEL_OK")
</pallas_src>

<mosaic_0001>
module attributes {stable_mosaic.version = 11 : i64} {
  func.func @_qua_loss_kernel(%arg0: i32, %arg1: memref<8x32xf32, #tpu.memory_space<vmem>>, %arg2: memref<8x32xf32, #tpu.memory_space<vmem>>, %arg3: memref<8x32xf32, #tpu.memory_space<vmem>>, %arg4: memref<8x32xf32, #tpu.memory_space<vmem>>, %arg5: memref<1x1xf32, #tpu.memory_space<vmem>>, %arg6: memref<1x1xf32, #tpu.memory_space<vmem>>) attributes {dimension_semantics = [#tpu.dimension_semantics<arbitrary>], iteration_bounds = array<i64: 1>, scalar_prefetch = 0 : i64, scratch_operands = 1 : i64, tpu.core_type = #tpu.core_type<tc>, window_params = [{transform_indices = @transform_0, window_bounds = array<i64: 8, 32>}, {transform_indices = @transform_1, window_bounds = array<i64: 8, 32>}, {transform_indices = @transform_2, window_bounds = array<i64: 8, 32>}, {transform_indices = @transform_3, window_bounds = array<i64: 8, 32>}, {pipeline_mode = #tpu.pipeline_mode<synchronous>, transform_indices = @transform_4, window_bounds = array<i64: 1, 1>}]} {
    %c0_i32 = arith.constant 0 : i32
    %0 = arith.cmpi eq, %arg0, %c0_i32 : i32
    %1 = arith.extui %0 : i1 to i32
    %c0_i32_0 = arith.constant 0 : i32
    %2 = arith.cmpi ne, %1, %c0_i32_0 : i32
    scf.if %2 {
      %cst_22 = arith.constant 0.000000e+00 : f32
      %42 = vector.broadcast %cst_22 : f32 to vector<1x1xf32>
      %c0_23 = arith.constant 0 : index
      %c0_24 = arith.constant 0 : index
      %43 = vector.load %arg6[%c0_23, %c0_24] : memref<1x1xf32, #tpu.memory_space<vmem>>, vector<1x1xf32>
      tpu.vector_store %arg6[%c0_23, %c0_24], %42 {strides = array<i32>} : memref<1x1xf32, #tpu.memory_space<vmem>>, vector<1x1xf32>,
    } else {
    }
    %c0 = arith.constant 0 : index
    %c0_1 = arith.constant 0 : index
    %3 = vector.load %arg1[%c0, %c0_1] : memref<8x32xf32, #tpu.memory_space<vmem>>, vector<8x32xf32>
    %c0_2 = arith.constant 0 : index
    %c0_3 = arith.constant 0 : index
    %4 = vector.load %arg2[%c0_2, %c0_3] : memref<8x32xf32, #tpu.memory_space<vmem>>, vector<8x32xf32>
    %c0_4 = arith.constant 0 : index
    %c0_5 = arith.constant 0 : index
    %5 = vector.load %arg3[%c0_4, %c0_5] : memref<8x32xf32, #tpu.memory_space<vmem>>, vector<8x32xf32>
    %c0_6 = arith.constant 0 : index
    %c0_7 = arith.constant 0 : index
    %6 = vector.load %arg4[%c0_6, %c0_7] : memref<8x32xf32, #tpu.memory_space<vmem>>, vector<8x32xf32>
    %cst = arith.constant 1.000000e+00 : f32
    %7 = vector.broadcast %cst : f32 to vector<32x1xf32>
    %8 = arith.subf %3, %4 : vector<8x32xf32>
    %9 = arith.mulf %8, %8 : vector<8x32xf32>
    %cst_8 = arith.constant dense<0.000000e+00> : vector<8x1xf32>
    %10 = tpu.matmul %9, %7, %cst_8 {dimension_numbers = #tpu.dot_dimension_numbers<[1], [0], [0], [1], [0, 0, 1, 1], [], []>} : vector<8x32xf32>, vector<32x1xf32>, vector<8x1xf32> -> vector<8x1xf32>
    %11 = math.sqrt %10 : vector<8x1xf32>
    %12 = arith.subf %3, %5 : vector<8x32xf32>
    %13 = arith.mulf %12, %12 : vector<8x32xf32>
    %cst_9 = arith.constant dense<0.000000e+00> : vector<8x1xf32>
    %14 = tpu.matmul %13, %7, %cst_9 {dimension_numbers = #tpu.dot_dimension_numbers<[1], [0], [0], [1], [0, 0, 1, 1], [], []>} : vector<8x32xf32>, vector<32x1xf32>, vector<8x1xf32> -> vector<8x1xf32>
    %15 = math.sqrt %14 : vector<8x1xf32>
    %16 = arith.subf %4, %6 : vector<8x32xf32>
    %17 = arith.mulf %16, %16 : vector<8x32xf32>
    %cst_10 = arith.constant dense<0.000000e+00> : vector<8x1xf32>
    %18 = tpu.matmul %17, %7, %cst_10 {dimension_numbers = #tpu.dot_dimension_numbers<[1], [0], [0], [1], [0, 0, 1, 1], [], []>} : vector<8x32xf32>, vector<32x1xf32>, vector<8x1xf32> -> vector<8x1xf32>
    %19 = math.sqrt %18 : vector<8x1xf32>
    %20 = arith.subf %11, %15 : vector<8x1xf32>
    %cst_11 = arith.constant 3.000000e-01 : f32
    %21 = vector.broadcast %cst_11 : f32 to vector<8x1xf32>
    %22 = arith.addf %20, %21 : vector<8x1xf32>
    %cst_12 = arith.constant 0.000000e+00 : f32
    %23 = vector.broadcast %cst_12 : f32 to vector<8x1xf32>
    %24 = arith.maximumf %22, %23 : vector<8x1xf32>
    %25 = arith.subf %11, %19 : vector<8x1xf32>
    %cst_13 = arith.constant 3.000000e-01 : f32
    %26 = vector.broadcast %cst_13 : f32 to vector<8x1xf32>
    %27 = arith.addf %25, %26 : vector<8x1xf32>
    %cst_14 = arith.constant 0.000000e+00 : f32
    %28 = vector.broadcast %cst_14 : f32 to vector<8x1xf32>
    %29 = arith.maximumf %27, %28 : vector<8x1xf32>
    %30 = arith.addf %24, %29 : vector<8x1xf32>
    %c0_15 = arith.constant 0 : index
    %c0_16 = arith.constant 0 : index
    %31 = vector.load %arg6[%c0_15, %c0_16] : memref<1x1xf32, #tpu.memory_space<vmem>>, vector<1x1xf32>
    %32 = vector.shape_cast %30 : vector<8x1xf32> to vector<1x8x1xf32>
    %cst_17 = arith.constant dense<0.000000e+00> : vector<1xf32>
    %33 = vector.multi_reduction <add>, %32, %cst_17 [1, 2] : vector<1x8x1xf32> to vector<1xf32>
    %34 = vector.shape_cast %33 : vector<1xf32> to vector<1x1x1xf32>
    %35 = vector.extract %34[0, 0, 0] : f32 from vector<1x1x1xf32>
    %36 = vector.broadcast %35 : f32 to vector<1x1xf32>
    %37 = arith.addf %31, %36 : vector<1x1xf32>
    %c0_18 = arith.constant 0 : index
    %c0_19 = arith.constant 0 : index
    %38 = vector.load %arg6[%c0_18, %c0_19] : memref<1x1xf32, #tpu.memory_space<vmem>>, vector<1x1xf32>
    tpu.vector_store %arg6[%c0_18, %c0_19], %37 {strides = array<i32>} : memref<1x1xf32, #tpu.memory_space<vmem>>, vector<1x1xf32>,
    %c0_i32_20 = arith.constant 0 : i32
    %39 = arith.cmpi eq, %arg0, %c0_i32_20 : i32
    %40 = arith.extui %39 : i1 to i32
    %c0_i32_21 = arith.constant 0 : i32
    %41 = arith.cmpi ne, %40, %c0_i32_21 : i32
    scf.if %41 {
      %c0_22 = arith.constant 0 : index
      %c0_23 = arith.constant 0 : index
      %42 = vector.load %arg6[%c0_22, %c0_23] : memref<1x1xf32, #tpu.memory_space<vmem>>, vector<1x1xf32>
      %cst_24 = arith.constant 1.250000e-01 : f32
      %43 = vector.broadcast %cst_24 : f32 to vector<1x1xf32>
      %44 = arith.mulf %42, %43 : vector<1x1xf32>
      %c0_25 = arith.constant 0 : index
      %c0_26 = arith.constant 0 : index
      %45 = vector.load %arg5[%c0_25, %c0_26] : memref<1x1xf32, #tpu.memory_space<vmem>>, vector<1x1xf32>
      tpu.vector_store %arg5[%c0_25, %c0_26], %44 {strides = array<i32>} : memref<1x1xf32, #tpu.memory_space<vmem>>, vector<1x1xf32>,
    } else {
    }
    return
  }
  func.func @transform_0(%arg0: i32) -> (i32, i32) {
    %c0_i32 = arith.constant 0 : i32
    %c0_i32_0 = arith.constant 0 : i32
    return %arg0, %c0_i32 : i32, i32
  }
  func.func @transform_1(%arg0: i32) -> (i32, i32) {
    %c0_i32 = arith.constant 0 : i32
    %c0_i32_0 = arith.constant 0 : i32
    return %arg0, %c0_i32 : i32, i32
  }
  func.func @transform_2(%arg0: i32) -> (i32, i32) {
    %c0_i32 = arith.constant 0 : i32
    %c0_i32_0 = arith.constant 0 : i32
    return %arg0, %c0_i32 : i32, i32
  }
  func.func @transform_3(%arg0: i32) -> (i32, i32) {
    %c0_i32 = arith.constant 0 : i32
    %c0_i32_0 = arith.constant 0 : i32
    return %arg0, %c0_i32 : i32, i32
  }
  func.func @transform_4(%arg0: i32) -> (i32, i32) {
    %c0_i32 = arith.constant 0 : i32
    %c0_i32_0 = arith.constant 0 : i32
    %c0_i32_1 = arith.constant 0 : i32
    return %c0_i32, %c0_i32_0 : i32, i32
  }
}

</mosaic_0001>

<bundles_post_ra>
// kernel: tpu_custom_call.1
= control target key start
LH: loop header
LB: loop body
LE: loop exit
PB: predicated region body
PF: predicated region fallthrough
CT: control target
= control target key end

     0   :  { %9 = vsyncpa [#allocation4], 0  ;;  %s622_s0 = inlined_call_operand.hbm [shape: f32[8,32], index: 0, kind: input, shape index: {}]   ;;  %s623_s1 = inlined_call_operand.hbm [shape: f32[8,32], index: 1, kind: input, shape index: {}]   ;;  %s624_s2 = inlined_call_operand.hbm [shape: f32[8,32], index: 2, kind: input, shape index: {}]   ;;  %s625_s3 = inlined_call_operand.vmem [shape: f32[8,32], index: 3, kind: input, shape index: {}]   ;;  %s626_s4 = inlined_call_operand.hbm [shape: f32[1,1], index: 4, kind: output, shape index: {}]  }
   0x1   :  { %10 = vsyncpa [#allocation7], 0 }
   0x2   :  { %11 = vsyncpa [#allocation5], 0  ;;  %s528_s15 = smov [#allocation6]   ;;  %s529_s17 = smov [#allocation3]  }
   0x3   :  { %s28_s16 = sshll.u32 %s528_s15, 4  ;;  %s18_s18 = sshll.u32 %s529_s17, 4  ;;  %s29_s16 = int_to_ptr.vmem [resolvable:$true] %s28_s16  ;;  %s19_s18 = int_to_ptr.vmem [resolvable:$true] %s18_s18 }
   0x4   :  { %s434_s21 = scalar_lea.hbm %s623_s1, 128 }
   0x5   :  { %p435_p0 = scmp.ne.s32.totalorder %s623_s1, %s434_s21  ;;  %p438_p1 = scmp.lt.u32.totalorder %s434_s21, %s623_s1 }
   0x7   :  { %p440_p2 = pnand %p438_p1, %p435_p0 }
   0x9   :  { %443 = shalt.err (!%p440_p2)
}
   0xa   :  { %s444_s26 = scalar_lea.vmem %s29_s16, 128  ;;  %p449_p4 = scmp.lt.s32.totalorder %s29_s16, %s29_s16 }
   0xb   :  { %p445_p3 = scmp.ne.s32.totalorder %s29_s16, %s444_s26  ;;  %p450_p5 = scmp.lt.s32.totalorder %s444_s26, %s444_s26 }
   0xd   :  { %p451_p6 = por %p450_p5, %p449_p4 }
   0xf   :  { %p452_p7 = pnand %p451_p6, %p445_p3 }
  0x11   :  { %455 = shalt.err (!%p452_p7)
}
  0x12   :  { %31 = dma.hbm_to_vmem [thread:$0]  %s623_s1, 128, %s29_s16, [#allocation7]  }
  0x13   :  { %s456_s5 = scalar_lea.hbm %s622_s0, 128 }
  0x14   :  { %p457_p8 = scmp.ne.s32.totalorder %s622_s0, %s456_s5  ;;  %p460_p9 = scmp.lt.u32.totalorder %s456_s5, %s622_s0 }
  0x16   :  { %p462_p10 = pnand %p460_p9, %p457_p8 }
  0x18   :  { %465 = shalt.err (!%p462_p10)
}
  0x19   :  { %s466_s10 = scalar_lea.vmem %s19_s18, 128  ;;  %p471_p12 = scmp.lt.s32.totalorder %s19_s18, %s19_s18 }
  0x1a   :  { %p467_p11 = scmp.ne.s32.totalorder %s19_s18, %s466_s10  ;;  %p472_p13 = scmp.lt.s32.totalorder %s466_s10, %s466_s10 }
  0x1c   :  { %p473_p0 = por %p472_p13, %p471_p12 }
  0x1e   :  { %p474_p1 = pnand %p473_p0, %p467_p11 }
  0x20   :  { %477 = shalt.err (!%p474_p1)
}
  0x21   :  { %21 = dma.hbm_to_vmem [thread:$0]  %s622_s0, 128, %s19_s18, [#allocation4]  }
  0x22   :  { %s530_s12 = smov [#allocation8]   ;;  %s478_s16 = scalar_lea.hbm %s624_s2, 128 }
  0x23   :  { %s38_s13 = sshll.u32 %s530_s12, 4  ;;  %p479_p2 = scmp.ne.s32.totalorder %s624_s2, %s478_s16  ;;  %s39_s13 = int_to_ptr.vmem [resolvable:$true] %s38_s13 }
  0x24   :  { %p482_p3 = scmp.lt.u32.totalorder %s478_s16, %s624_s2 }
  0x26   :  { %p484_p4 = pnand %p482_p3, %p479_p2 }
  0x28   :  { %487 = shalt.err (!%p484_p4)
}
  0x29   :  { %s488_s22 = scalar_lea.vmem %s39_s13, 128  ;;  %p493_p6 = scmp.lt.s32.totalorder %s39_s13, %s39_s13 }
  0x2a   :  { %p489_p5 = scmp.ne.s32.totalorder %s39_s13, %s488_s22  ;;  %p494_p7 = scmp.lt.s32.totalorder %s488_s22, %s488_s22 }
  0x2c   :  { %p495_p8 = por %p494_p7, %p493_p6 }
  0x2e   :  { %p496_p9 = pnand %p495_p8, %p489_p5 }
  0x30   :  { %499 = shalt.err (!%p496_p9)
}
  0x31   :  { %41 = dma.hbm_to_vmem [thread:$0]  %s624_s2, 128, %s39_s13, [#allocation7]  }
  0x32   :  { %522 = dma.done.wait [#allocation4], 128  }
  0x33   :  { %523 = vsyncadd [#allocation4], 4294967168 }
  0x34   :  { %524 = dma.done.wait [#allocation7], 256  }
  0x35   :  { %525 = vsyncadd [#allocation7], 4294967040  ;;  %v531_v0 = vmov 0.0|0.0   ;;  %v532_v1 = vmov 1.0|1.0   ;;  %vm533_vm0 = vmmov 0  }
  0x36   :  { %406 = vmatprep.subr.bf16.mxu0 %v531_v0  ;;  %410 = vmatprep.subr.bf16.mxu1 %v531_v0  ;;  %v534_v2 = vmov 0.0   ;;  %v59_v3 = vld [vmem:[#allocation3] sm:$0xff]  ;;  %v60_v4 = vld [vmem:[#allocation6] sm:$0xff]  ;;  %v61_v6 = vld [vmem:[#allocation8] sm:$0xff]  ;;  %vm65_vm1 = vcmask 261120   ;;  %vm318_vm8 = vcmask 7168  }
  0x37   :  { %407 = vmatpush3.bf16.msra.mxu0 %v532_v1  ;;  %411 = vmatpush3.bf16.msra.mxu1 %v532_v1  ;;  %v63_v5 = vsub.f32 %v59_v3, %v60_v4  ;;  %v62_v7 = vld [vmem:[%s625_s3] sm:$0xff]  ;;  %v146_v8 = vsub.f32 %v59_v3, %v61_v6  ;;  %vm57_vm9 = vcmask 0   ;;  %s535_s24 = smov [#allocation9]  }
  0x38   :  { %408 = vmatprep.subr.bf16.mxu0 %v531_v0  ;;  %412 = vmatprep.subr.bf16.mxu1 %v531_v0  ;;  %v228_v11 = vsub.f32 %v60_v4, %v62_v7  ;;  %58 = vst.msk [vmem:[#allocation2] sm:$0x1] %vm57_vm9, %v534_v2  ;;  %s345_s25 = sshll.u32 %s535_s24, 4  ;;  %s346_s25 = int_to_ptr.vmem [resolvable:$true] %s345_s25 }
  0x39   :  { %381 = vmatprep.mubr.msk.f32.mxu0 %vm533_vm0, %v534_v2  ;;  %392 = vmatprep.mubr.msk.f32.mxu1 %vm533_vm0, %v534_v2  ;;  %v64_v9 = vmul.f32 %v63_v5, %v63_v5  ;;  %v147_v10 = vmul.f32 %v146_v8, %v146_v8  ;;  %s500_s26 = scalar_lea.vmem %s346_s25, 16  ;;  %s504_s27 = scalar_lea.vmem %s346_s25, 32 }
  0x3a   :  { %v229_v12 = vmul.f32 %v228_v11, %v228_v11  ;;  %p501_p10 = scmp.ne.s32.totalorder %s346_s25, %s500_s26  ;;  %p505_p11 = scmp.lt.s32.totalorder %s346_s25, %s346_s25 }
  0x3b   :  { %409 = vmatpush3.bf16.msra.mxu0 %v532_v1  ;;  %413 = vmatpush3.bf16.msra.mxu1 %v532_v1  ;;  %p506_p12 = scmp.lt.s32.totalorder %s504_s27, %s500_s26 }
  0x3c   :  { %414 = vmatprep.subr.bf16.mxu0 %v531_v0 }
  0x3d   :  { %p507_p13 = por %p506_p12, %p505_p11 }
  0x3e   :  { %382 = vmatmul.mubr.msk.f32.vlgmr.msra.gmra.mrb[0].mxu0 %vm65_vm1, %v64_v9  ;;  %393 = vmatmul.mubr.msk.f32.vlgmr.msra.gmra.mrb[0].mxu1 %vm65_vm1, %v147_v10 }
  0x3f   :  { %415 = vmatpush3.bf16.msra.mxu0 %v532_v1  ;;  %403 = vmatprep.mubr.msk.f32.mxu0 %vm533_vm0, %v534_v2  ;;  %v317_v49 = vld [vmem:[#allocation2] sm:$0x1]  ;;  %p508_p0 = pnand %p507_p13, %p501_p10 }
  0x40   :  { %416 = vmatprep.subr.bf16.mxu0 %v531_v0 }
  0x43   :  { %417 = vmatpush3.bf16.msra.mxu0 %v532_v1 }
  0x46   :  { %404 = vmatmul.mubr.msk.f32.vlgmr.msra.gmra.mrb[2].mxu0 %vm65_vm1, %v229_v12 }
 0x111   :  { %v135_v13 = vpop.f32.mrb[0].mxu0  ;;  %v217_v14 = vpop.f32.mrb[0].mxu1 }
 0x112   :  { %428 = vrsqrt.f32 %v135_v13  ;;  %v383_v15 = vpop.f32.mrb[1].mxu0  ;;  %v394_v16 = vpop.f32.mrb[1].mxu1  ;;  %vm141_vm2 = vcmp.eq.f32.partialorder %v135_v13, inf  ;;  %v144_v23 = vand.u32 2147483648, %v135_v13  ;;  %vm143_vm3 = vcmp.eq.f32.partialorder %v135_v13, 0.0 }
 0x113   :  { %430 = vrsqrt.f32 %v217_v14  ;;  %vm223_vm4 = vcmp.eq.f32.partialorder %v217_v14, inf  ;;  %v226_v25 = vand.u32 2147483648, %v217_v14  ;;  %vm225_vm5 = vcmp.eq.f32.partialorder %v217_v14, 0.0 }
 0x119   :  { %v299_v17 = vpop.f32.mrb[2].mxu0 }
 0x11a   :  { %432 = vrsqrt.f32 %v299_v17  ;;  %v405_v18 = vpop.f32.mrb[3].mxu0  ;;  %vm305_vm6 = vcmp.eq.f32.partialorder %v299_v17, inf  ;;  %v308_v32 = vand.u32 2147483648, %v299_v17  ;;  %vm307_vm7 = vcmp.eq.f32.partialorder %v299_v17, 0.0 }
 0x11c   :  { %v429_v19 = vpop.eup %428 }
 0x11d   :  { %v431_v20 = vpop.eup %430  ;;  %v140_v21 = vmul.f32 %v429_v19, %v135_v13 }
 0x11e   :  { %v222_v22 = vmul.f32 %v431_v20, %v217_v14 }
 0x11f   :  { %v142_v24 = vsel %vm141_vm2, %v135_v13, %v140_v21 }
 0x120   :  { %v145_v26 = vsel %vm143_vm3, %v144_v23, %v142_v24  ;;  %v224_v27 = vsel %vm223_vm4, %v217_v14, %v222_v22 }
 0x121   :  { %v227_v28 = vsel %vm225_vm5, %v226_v25, %v224_v27 }
 0x122   :  { %v310_v29 = vsub.f32 %v145_v26, %v227_v28 }
 0x124   :  { %v433_v30 = vpop.eup %432  ;;  %v311_v35 = vadd.f32 0.3, %v310_v29 }
 0x125   :  { %v304_v31 = vmul.f32 %v433_v30, %v299_v17 }
 0x126   :  { %v312_v38 = vmax.f32 %v311_v35, 0.0 }
 0x127   :  { %v306_v33 = vsel %vm305_vm6, %v299_v17, %v304_v31 }
 0x128   :  { %v309_v34 = vsel %vm307_vm7, %v308_v32, %v306_v33 }
 0x129   :  { %v313_v36 = vsub.f32 %v145_v26, %v309_v34 }
 0x12b   :  { %v314_v37 = vadd.f32 0.3, %v313_v36 }
 0x12d   :  { %v315_v39 = vmax.f32 %v314_v37, 0.0 }
 0x12f   :  { %v316_v40 = vadd.f32 %v315_v39, %v312_v38 }
 0x131   :  { %v319_v41 = vsel %vm318_vm8, %v316_v40, 0.0 }
 0x132   :  { %320 = vadd.xlane.f32.xlu0 %v319_v41 }
 0x1bf   :  { %v321_v42 = vpop.xlane.xlu0 %320 }
 0x1c0   :  { %v322_v43 = vrot.slane %v321_v42, 4 }
 0x1c2   :  { %v323_v44 = vadd.f32 %v322_v43, %v321_v42 }
 0x1c4   :  { %v324_v45 = vrot.slane %v323_v44, 2 }
 0x1c6   :  { %v325_v46 = vadd.f32 %v324_v45, %v323_v44 }
 0x1c8   :  { %v326_v47 = vrot.slane %v325_v46, 1 }
 0x1ca   :  { %v327_v48 = vadd.f32 %v326_v47, %v325_v46 }
 0x1cc   :  { %418 = vpush %v327_v48 }
 0x1fd   :  { %s419_s3 = spop %418 }
 0x1fe   :  { %v329_v50 = vstv %s419_s3 }
 0x1ff   :  { %v330_v51 = vadd.f32 %v329_v50, %v317_v49 }
 0x201   :  { %332 = vst.msk [vmem:[#allocation2] sm:$0x1] %vm57_vm9, %v330_v51 }
 0x208   :  { %v336_v52 = vld [vmem:[#allocation2] sm:$0x1] }
 0x209   :  { %v337_v53 = vmul.f32 0.125, %v336_v52 }
 0x20b   :  { %338 = vst.msk [vmem:[#allocation9] sm:$0x1] %vm57_vm9, %v337_v53 }
 0x20c   :  { %511 = shalt.err (!%p508_p0)
}
 0x20d   :  { %s512_s30 = scalar_lea.hbm %s626_s4, 16 }
 0x20e   :  { %p513_p1 = scmp.ne.s32.totalorder %s626_s4, %s512_s30  ;;  %p516_p2 = scmp.lt.u32.totalorder %s512_s30, %s626_s4 }
 0x210   :  { %p518_p3 = pnand %p516_p2, %p513_p1 }
 0x212   :  { %521 = shalt.err (!%p518_p3)
}
 0x213   :  { %348 = dma.vmem_to_hbm [thread:$0]  %s346_s25, 16, %s626_s4, [#allocation5]  }
 0x214   :  { %526 = dma.done.wait [#allocation5], 16  }
 0x215   :  { %527 = vsyncadd [#allocation5], 4294967280 }
 0x216   :  { %352 = vsyncpa [#allocation4], 1 }
 0x217   :  { %353 = vsyncpa [#allocation7], 1 }
 0x218   :  { %354 = vsyncpa [#allocation5], 1 }

</bundles_post_ra>
